<compile_context>
chip_gen: v6e
topology: v6e:2x2x1
jax: 0.10.0
libtpu: 0.0.40
codegen_flags: <defaults>
</compile_context>

<pallas_src>
import jax
import jax.numpy as jnp
from jax.experimental import pallas as pl
from jax.experimental.pallas import tpu as pltpu


def _round_up(n: int, m: int) -> int:
    return ((n + m - 1) // m) * m


def mlp_kernel(x_ref, w_ref, b_ref, o_ref):
    # x_ref: (TM, P) bf16, w_ref: (3, P, P) bf16, b_ref: (3, 1, P) f32, o_ref: (TM, P) f32
    x = x_ref[...]
    h1 = jnp.dot(x, w_ref[0], preferred_element_type=jnp.float32) + b_ref[0]
    h1 = jnp.maximum(h1, 0.0)
    h2 = jnp.dot(h1.astype(jnp.bfloat16), w_ref[1],
                 preferred_element_type=jnp.float32) + b_ref[1]
    h2 = jnp.maximum(h2, 0.0)
    out = jnp.dot(h2.astype(jnp.bfloat16), w_ref[2],
                  preferred_element_type=jnp.float32) + b_ref[2]
    o_ref[...] = out


def mlp_forward(x, params):
    w1, b1, w2, b2, w3, b3 = params
    batch, input_dim = x.shape
    hidden = w1.shape[1]
    output_dim = w3.shape[1]

    # One common padded feature width so all three weights pack into a single slab.
    P = max(_round_up(input_dim, 128), _round_up(hidden, 128), _round_up(output_dim, 128))
    TM = min(128, _round_up(batch, 8))
    B_pad = _round_up(batch, TM)

    def pad_w(w):
        return jnp.pad(w, ((0, P - w.shape[0]), (0, P - w.shape[1])))

    def pad_b(b):
        b = b.reshape(1, -1)
        return jnp.pad(b, ((0, 0), (0, P - b.shape[1])))

    W = jnp.stack([pad_w(w1), pad_w(w2), pad_w(w3)]).astype(jnp.bfloat16)   # (3, P, P)
    B = jnp.stack([pad_b(b1), pad_b(b2), pad_b(b3)]).astype(jnp.float32)    # (3, 1, P)
    x_p = jnp.pad(x, ((0, B_pad - batch), (0, P - input_dim))).astype(jnp.bfloat16)

    flops = 3 * 2 * B_pad * P * P
    bytes_accessed = (x_p.size * 2 + W.size * 2 + B.size * 4 + B_pad * P * 4)

    out_padded = pl.pallas_call(
        mlp_kernel,
        out_shape=jax.ShapeDtypeStruct((B_pad, P), jnp.float32),
        grid_spec=pltpu.PrefetchScalarGridSpec(
            num_scalar_prefetch=0,
            grid=(B_pad // TM,),
            in_specs=[
                pl.BlockSpec((TM, P), lambda i: (i, 0)),        # x tile, pipelined over batch
                pl.BlockSpec((3, P, P), lambda i: (0, 0, 0)),   # packed weights, resident
                pl.BlockSpec((3, 1, P), lambda i: (0, 0, 0)),   # packed biases, resident
            ],
            out_specs=pl.BlockSpec((TM, P), lambda i: (i, 0)),
        ),
        compiler_params=pltpu.CompilerParams(
            dimension_semantics=("parallel",),
        ),
        cost_estimate=pl.CostEstimate(
            flops=flops, transcendentals=0, bytes_accessed=bytes_accessed),
    )(x_p, W, B)

    return out_padded[:batch, :output_dim]


def init_params(key, input_dim, hidden, output_dim):
    # xavier-normal weights (matches nn.init.xavier_normal_), zero biases.
    k1, k2, k3 = jax.random.split(key, 3)

    def xavier(k, fan_in, fan_out):
        std = jnp.sqrt(2.0 / (fan_in + fan_out))
        return jax.random.normal(k, (fan_in, fan_out), dtype=jnp.float32) * std

    w1 = xavier(k1, input_dim, hidden)
    b1 = jnp.zeros((1, hidden), dtype=jnp.float32)
    w2 = xavier(k2, hidden, hidden)
    b2 = jnp.zeros((1, hidden), dtype=jnp.float32)
    w3 = xavier(k3, hidden, output_dim)
    b3 = jnp.zeros((1, output_dim), dtype=jnp.float32)
    return (w1, b1, w2, b2, w3, b3)


def mlp_reference(x, params):
    # Reference mirroring the kernel's bf16-operand / f32-accumulate numerics.
    w1, b1, w2, b2, w3, b3 = params
    r = lambda a: a.astype(jnp.bfloat16).astype(jnp.float32)
    h1 = jnp.maximum(r(x) @ r(w1) + b1, 0.0)
    h2 = jnp.maximum(r(h1) @ r(w2) + b2, 0.0)
    return r(h2) @ r(w3) + b3


if __name__ == "__main__":
    batch, input_dim, hidden, output_dim = 8, 32, 100, 10

    key = jax.random.PRNGKey(0)
    kx, kp = jax.random.split(key)
    x = jax.random.normal(kx, (batch, input_dim), dtype=jnp.float32)
    params = init_params(kp, input_dim, hidden, output_dim)

    out = jax.block_until_ready(mlp_forward(x, params))
    ref = mlp_reference(x, params)

    assert out.shape == (batch, output_dim)
    assert jnp.allclose(out, ref, atol=2e-3, rtol=2e-3), float(jnp.max(jnp.abs(out - ref)))

    print("KERNEL_OK")
</pallas_src>

<mosaic_0001>
module attributes {stable_mosaic.version = 11 : i64} {
  func.func @mlp_kernel(%arg0: i32, %arg1: memref<8x128xbf16, #tpu.memory_space<vmem>>, %arg2: memref<3x128x128xbf16, #tpu.memory_space<vmem>>, %arg3: memref<3x1x128xf32, #tpu.memory_space<vmem>>, %arg4: memref<8x128xf32, #tpu.memory_space<vmem>>) attributes {dimension_semantics = [#tpu.dimension_semantics<parallel>], iteration_bounds = array<i64: 1>, scalar_prefetch = 0 : i64, scratch_operands = 0 : i64, tpu.core_type = #tpu.core_type<tc>, window_params = [{transform_indices = @transform_0, window_bounds = array<i64: 8, 128>}, {pipeline_mode = #tpu.pipeline_mode<synchronous>, transform_indices = @transform_1, window_bounds = array<i64: 3, 128, 128>}, {pipeline_mode = #tpu.pipeline_mode<synchronous>, transform_indices = @transform_2, window_bounds = array<i64: 3, 1, 128>}, {transform_indices = @transform_3, window_bounds = array<i64: 8, 128>}]} {
    %c0 = arith.constant 0 : index
    %c0_0 = arith.constant 0 : index
    %0 = vector.load %arg1[%c0, %c0_0] : memref<8x128xbf16, #tpu.memory_space<vmem>>, vector<8x128xbf16>
    %c0_1 = arith.constant 0 : index
    %c0_2 = arith.constant 0 : index
    %c0_3 = arith.constant 0 : index
    %1 = vector.load %arg2[%c0_1, %c0_2, %c0_3] : memref<3x128x128xbf16, #tpu.memory_space<vmem>>, vector<1x128x128xbf16>
    %2 = vector.shape_cast %1 : vector<1x128x128xbf16> to vector<128x128xbf16>
    %cst = arith.constant dense<0.000000e+00> : vector<8x128xf32>
    %3 = tpu.matmul %0, %2, %cst {dimension_numbers = #tpu.dot_dimension_numbers<[1], [0], [0], [1], [0, 0, 1, 1], [], []>} : vector<8x128xbf16>, vector<128x128xbf16>, vector<8x128xf32> -> vector<8x128xf32>
    %c0_4 = arith.constant 0 : index
    %c0_5 = arith.constant 0 : index
    %c0_6 = arith.constant 0 : index
    %4 = vector.load %arg3[%c0_4, %c0_5, %c0_6] : memref<3x1x128xf32, #tpu.memory_space<vmem>>, vector<1x1x128xf32>
    %5 = vector.shape_cast %4 : vector<1x1x128xf32> to vector<1x128xf32>
    %6 = vector.broadcast %5 : vector<1x128xf32> to vector<8x128xf32>
    %7 = arith.addf %3, %6 : vector<8x128xf32>
    %cst_7 = arith.constant 0.000000e+00 : f32
    %8 = vector.broadcast %cst_7 : f32 to vector<8x128xf32>
    %9 = arith.maximumf %7, %8 : vector<8x128xf32>
    %10 = arith.truncf %9 : vector<8x128xf32> to vector<8x128xbf16>
    %c1 = arith.constant 1 : index
    %c0_8 = arith.constant 0 : index
    %c0_9 = arith.constant 0 : index
    %11 = vector.load %arg2[%c1, %c0_8, %c0_9] : memref<3x128x128xbf16, #tpu.memory_space<vmem>>, vector<1x128x128xbf16>
    %12 = vector.shape_cast %11 : vector<1x128x128xbf16> to vector<128x128xbf16>
    %cst_10 = arith.constant dense<0.000000e+00> : vector<8x128xf32>
    %13 = tpu.matmul %10, %12, %cst_10 {dimension_numbers = #tpu.dot_dimension_numbers<[1], [0], [0], [1], [0, 0, 1, 1], [], []>} : vector<8x128xbf16>, vector<128x128xbf16>, vector<8x128xf32> -> vector<8x128xf32>
    %c1_11 = arith.constant 1 : index
    %c0_12 = arith.constant 0 : index
    %c0_13 = arith.constant 0 : index
    %14 = vector.load %arg3[%c1_11, %c0_12, %c0_13] : memref<3x1x128xf32, #tpu.memory_space<vmem>>, vector<1x1x128xf32>
    %15 = vector.shape_cast %14 : vector<1x1x128xf32> to vector<1x128xf32>
    %16 = vector.broadcast %15 : vector<1x128xf32> to vector<8x128xf32>
    %17 = arith.addf %13, %16 : vector<8x128xf32>
    %cst_14 = arith.constant 0.000000e+00 : f32
    %18 = vector.broadcast %cst_14 : f32 to vector<8x128xf32>
    %19 = arith.maximumf %17, %18 : vector<8x128xf32>
    %20 = arith.truncf %19 : vector<8x128xf32> to vector<8x128xbf16>
    %c2 = arith.constant 2 : index
    %c0_15 = arith.constant 0 : index
    %c0_16 = arith.constant 0 : index
    %21 = vector.load %arg2[%c2, %c0_15, %c0_16] : memref<3x128x128xbf16, #tpu.memory_space<vmem>>, vector<1x128x128xbf16>
    %22 = vector.shape_cast %21 : vector<1x128x128xbf16> to vector<128x128xbf16>
    %cst_17 = arith.constant dense<0.000000e+00> : vector<8x128xf32>
    %23 = tpu.matmul %20, %22, %cst_17 {dimension_numbers = #tpu.dot_dimension_numbers<[1], [0], [0], [1], [0, 0, 1, 1], [], []>} : vector<8x128xbf16>, vector<128x128xbf16>, vector<8x128xf32> -> vector<8x128xf32>
    %c2_18 = arith.constant 2 : index
    %c0_19 = arith.constant 0 : index
    %c0_20 = arith.constant 0 : index
    %24 = vector.load %arg3[%c2_18, %c0_19, %c0_20] : memref<3x1x128xf32, #tpu.memory_space<vmem>>, vector<1x1x128xf32>
    %25 = vector.shape_cast %24 : vector<1x1x128xf32> to vector<1x128xf32>
    %26 = vector.broadcast %25 : vector<1x128xf32> to vector<8x128xf32>
    %27 = arith.addf %23, %26 : vector<8x128xf32>
    %c0_21 = arith.constant 0 : index
    %c0_22 = arith.constant 0 : index
    %28 = vector.load %arg4[%c0_21, %c0_22] : memref<8x128xf32, #tpu.memory_space<vmem>>, vector<8x128xf32>
    tpu.vector_store %arg4[%c0_21, %c0_22], %27 {strides = array<i32>} : memref<8x128xf32, #tpu.memory_space<vmem>>, vector<8x128xf32>,
    return
  }
  func.func @transform_0(%arg0: i32) -> (i32, i32) {
    %c0_i32 = arith.constant 0 : i32
    %c0_i32_0 = arith.constant 0 : i32
    return %arg0, %c0_i32 : i32, i32
  }
  func.func @transform_1(%arg0: i32) -> (i32, i32, i32) {
    %c0_i32 = arith.constant 0 : i32
    %c0_i32_0 = arith.constant 0 : i32
    %c0_i32_1 = arith.constant 0 : i32
    %c0_i32_2 = arith.constant 0 : i32
    return %c0_i32, %c0_i32_0, %c0_i32_1 : i32, i32, i32
  }
  func.func @transform_2(%arg0: i32) -> (i32, i32, i32) {
    %c0_i32 = arith.constant 0 : i32
    %c0_i32_0 = arith.constant 0 : i32
    %c0_i32_1 = arith.constant 0 : i32
    %c0_i32_2 = arith.constant 0 : i32
    return %c0_i32, %c0_i32_0, %c0_i32_1 : i32, i32, i32
  }
  func.func @transform_3(%arg0: i32) -> (i32, i32) {
    %c0_i32 = arith.constant 0 : i32
    %c0_i32_0 = arith.constant 0 : i32
    return %arg0, %c0_i32 : i32, i32
  }
}

</mosaic_0001>

<bundles_post_ra>
// kernel: tpu_custom_call.1
= control target key start
LH: loop header
LB: loop body
LE: loop exit
PB: predicated region body
PF: predicated region fallthrough
CT: control target
= control target key end

     0   :  { %8 = vsyncpa [#allocation3], 0  ;;  %s689_s0 = inlined_call_operand.hbm [shape: bf16[8,128], index: 0, kind: input, shape index: {}]   ;;  %s690_s1 = inlined_call_operand.hbm [shape: bf16[3,128,128], index: 1, kind: input, shape index: {}]   ;;  %s691_s2 = inlined_call_operand.vmem [shape: f32[3,1,128], index: 2, kind: input, shape index: {}]   ;;  %s692_s3 = inlined_call_operand.hbm [shape: f32[8,128], index: 3, kind: output, shape index: {}]  }
   0x1   :  { %9 = vsyncpa [#allocation6], 0 }
   0x2   :  { %10 = vsyncpa [#allocation4], 0  ;;  %s614_s12 = smov [#allocation2]   ;;  %s615_s14 = smov [#allocation5]  }
   0x3   :  { %s17_s13 = sshll.u32 %s614_s12, 4  ;;  %s26_s15 = sshll.u32 %s615_s14, 4  ;;  %s18_s13 = int_to_ptr.vmem [resolvable:$true] %s17_s13  ;;  %s27_s15 = int_to_ptr.vmem [resolvable:$true] %s26_s15 }
   0x4   :  { %s556_s16 = scalar_lea.vmem %s18_s13, 64  ;;  %p561_p1 = scmp.lt.s32.totalorder %s18_s13, %s18_s13 }
   0x5   :  { %p557_p0 = scmp.ne.s32.totalorder %s18_s13, %s556_s16  ;;  %p562_p2 = scmp.lt.s32.totalorder %s556_s16, %s556_s16 }
   0x7   :  { %p563_p3 = por %p562_p2, %p561_p1 }
   0x9   :  { %p564_p4 = pnand %p563_p3, %p557_p0 }
   0xb   :  { %567 = shalt.err (!%p564_p4)
}
   0xc   :  { %20 = dma.hbm_to_vmem [thread:$0]  %s689_s0, 64, %s18_s13, [#allocation3]  }
   0xd   :  { %s576_s19 = scalar_lea.vmem %s27_s15, 3072  ;;  %p581_p6 = scmp.lt.s32.totalorder %s27_s15, %s27_s15 }
   0xe   :  { %p577_p5 = scmp.ne.s32.totalorder %s27_s15, %s576_s19  ;;  %p582_p7 = scmp.lt.s32.totalorder %s576_s19, %s576_s19 }
  0x10   :  { %p583_p8 = por %p582_p7, %p581_p6 }
  0x12   :  { %p584_p9 = pnand %p583_p8, %p577_p5 }
  0x14   :  { %587 = shalt.err (!%p584_p9)
}
  0x15   :  { %s616_s20 = smov 64   ;;  %s617_s21 = smov 4  }
  0x16   :  { %32 = dma.hbm_to_vmem [thread:$0]  %s690_s1, 3072, %s27_s15, [#allocation6], %s616_s20, %s616_s20, %s617_s21  }
  0x17   :  { %608 = dma.done.wait [#allocation3], 64  }
  0x18   :  { %609 = vsyncadd [#allocation3], 4294967232 }
  0x19   :  { %610 = dma.done.wait [#allocation6], 3072  }
  0x1a   :  { %611 = vsyncadd [#allocation6], 4294964224  ;;  %v618_v0 = vmov 0.0   ;;  %vm619_vm0 = vmmov 0   ;;  %v524_v1 = vld [vmem:[#allocation5 + $0x38] sm:$0xff]   ;;  %v525_v2 = vld [vmem:[#allocation5 + $0x30] sm:$0xff]  }
  0x1b   :  { %457 = vmatprep.subr.bf16.mxu0 %v618_v0  ;;  %473 = vmatprep.mubr.msk.bf16.mxu0 %vm619_vm0, %v618_v0  ;;  %v526_v3 = vld [vmem:[#allocation5 + $0x28] sm:$0xff]   ;;  %v532_v4 = vld [vmem:[#allocation5 + $0x78] sm:$0xff]   ;;  %v527_v5 = vld [vmem:[#allocation5 + $0x20] sm:$0xff]   ;;  %s620_s28 = smov [#allocation7]  }
  0x1c   :  { %477 = vmatprep.subr.bf16.mxu1 %v618_v0  ;;  %493 = vmatprep.mubr.msk.bf16.mxu1 %vm619_vm0, %v618_v0  ;;  %v533_v6 = vld [vmem:[#allocation5 + $0x70] sm:$0xff]   ;;  %v528_v7 = vld [vmem:[#allocation5 + $0x18] sm:$0xff]   ;;  %v534_v8 = vld [vmem:[#allocation5 + $0x68] sm:$0xff]   ;;  %s391_s29 = sshll.u32 %s620_s28, 4  ;;  %s392_s29 = int_to_ptr.vmem [resolvable:$true] %s391_s29 }
  0x1d   :  { %458 = vmatpush3.bf16.msra.mxu0 %v524_v1  ;;  %478 = vmatpush3.bf16.msra.mxu1 %v532_v4  ;;  %v529_v9 = vld [vmem:[#allocation5 + $0x10] sm:$0xff]   ;;  %v535_v10 = vld [vmem:[#allocation5 + $0x60] sm:$0xff]   ;;  %v530_v11 = vld [vmem:[#allocation5 + $0x8] sm:$0xff]   ;;  %s588_s30 = scalar_lea.vmem %s392_s29, 128  ;;  %p593_p11 = scmp.lt.s32.totalorder %s392_s29, %s392_s29 }
  0x1e   :  { %459 = vmatprep.subr.bf16.mxu0 %v618_v0  ;;  %479 = vmatprep.subr.bf16.mxu1 %v618_v0  ;;  %v536_v12 = vld [vmem:[#allocation5 + $0x58] sm:$0xff]   ;;  %v531_v13 = vld [vmem:[#allocation5] sm:$0xff]   ;;  %v537_v14 = vld [vmem:[#allocation5 + $0x50] sm:$0xff]   ;;  %p589_p10 = scmp.ne.s32.totalorder %s392_s29, %s588_s30  ;;  %p594_p12 = scmp.lt.s32.totalorder %s588_s30, %s588_s30 }
  0x1f   :  { %v42_v15 = vld [vmem:[#allocation2] sm:$0xf]  ;;  %v538_v16 = vld [vmem:[#allocation5 + $0x48] sm:$0xff]   ;;  %v539_v17 = vld [vmem:[#allocation5 + $0x40] sm:$0xff]  }
  0x20   :  { %v540_v18 = vld [vmem:[#allocation5 + $0xb8] sm:$0xff]   ;;  %v541_v19 = vld [vmem:[#allocation5 + $0xb0] sm:$0xff]   ;;  %v542_v20 = vld [vmem:[#allocation5 + $0xa8] sm:$0xff]   ;;  %p595_p13 = por %p594_p12, %p593_p11 }
  0x21   :  { %460 = vmatpush3.bf16.msra.mxu0 %v525_v2  ;;  %480 = vmatpush3.bf16.msra.mxu1 %v533_v6  ;;  %v543_v21 = vld [vmem:[#allocation5 + $0xa0] sm:$0xff]   ;;  %v544_v22 = vld [vmem:[#allocation5 + $0x98] sm:$0xff]   ;;  %v545_v23 = vld [vmem:[#allocation5 + $0x90] sm:$0xff]  }
  0x22   :  { %461 = vmatprep.subr.bf16.mxu0 %v618_v0  ;;  %481 = vmatprep.subr.bf16.mxu1 %v618_v0  ;;  %v401_v24 = vld [vmem:[%s691_s2] ss:$0 sm:$0xff]  ;;  %v546_v32 = vld [vmem:[#allocation5 + $0x88] sm:$0xff]   ;;  %v547_v33 = vld [vmem:[#allocation5 + $0x80] sm:$0xff]   ;;  %p596_p0 = pnand %p595_p13, %p589_p10 }
  0x23   :  { %v411_v34 = vld [vmem:[%s691_s2 + $0x1] ss:$0 sm:$0xff]  ;;  %v421_v42 = vld [vmem:[%s691_s2 + $0x2] ss:$0 sm:$0xff] }
  0x25   :  { %462 = vmatpush3.bf16.msra.mxu0 %v526_v3  ;;  %482 = vmatpush3.bf16.msra.mxu1 %v534_v8 }
  0x26   :  { %463 = vmatprep.subr.bf16.mxu0 %v618_v0  ;;  %483 = vmatprep.subr.bf16.mxu1 %v618_v0 }
  0x29   :  { %464 = vmatpush3.bf16.msra.mxu0 %v527_v5  ;;  %484 = vmatpush3.bf16.msra.mxu1 %v535_v10 }
  0x2a   :  { %465 = vmatprep.subr.bf16.mxu0 %v618_v0  ;;  %485 = vmatprep.subr.bf16.mxu1 %v618_v0 }
  0x2d   :  { %466 = vmatpush3.bf16.msra.mxu0 %v528_v7  ;;  %486 = vmatpush3.bf16.msra.mxu1 %v536_v12 }
  0x2e   :  { %467 = vmatprep.subr.bf16.mxu0 %v618_v0  ;;  %487 = vmatprep.subr.bf16.mxu1 %v618_v0 }
  0x31   :  { %468 = vmatpush3.bf16.msra.mxu0 %v529_v9  ;;  %488 = vmatpush3.bf16.msra.mxu1 %v537_v14 }
  0x32   :  { %469 = vmatprep.subr.bf16.mxu0 %v618_v0  ;;  %489 = vmatprep.subr.bf16.mxu1 %v618_v0 }
  0x35   :  { %470 = vmatpush3.bf16.msra.mxu0 %v530_v11  ;;  %490 = vmatpush3.bf16.msra.mxu1 %v538_v16 }
  0x36   :  { %471 = vmatprep.subr.bf16.mxu0 %v618_v0  ;;  %491 = vmatprep.subr.bf16.mxu1 %v618_v0 }
  0x39   :  { %472 = vmatpush3.bf16.msra.mxu0 %v531_v13  ;;  %492 = vmatpush3.bf16.msra.mxu1 %v539_v17 }
  0x3a   :  { %497 = vmatprep.subr.bf16.mxu0 %v618_v0 }
  0x3c   :  { %474 = vmatmul.mubr.bf16.vlgmr.msra.gmra.mxu0 %v42_v15 }
  0x3d   :  { %513 = vmatprep.mubr.msk.bf16.mxu0 %vm619_vm0, %v618_v0  ;;  %498 = vmatpush3.bf16.msra.mxu0 %v540_v18 }
  0x3e   :  { %499 = vmatprep.subr.bf16.mxu0 %v618_v0 }
  0x41   :  { %500 = vmatpush3.bf16.msra.mxu0 %v541_v19 }
  0x42   :  { %501 = vmatprep.subr.bf16.mxu0 %v618_v0 }
  0x45   :  { %502 = vmatpush3.bf16.msra.mxu0 %v542_v20 }
  0x46   :  { %503 = vmatprep.subr.bf16.mxu0 %v618_v0 }
  0x49   :  { %504 = vmatpush3.bf16.msra.mxu0 %v543_v21 }
  0x4a   :  { %505 = vmatprep.subr.bf16.mxu0 %v618_v0 }
  0x4d   :  { %506 = vmatpush3.bf16.msra.mxu0 %v544_v22 }
  0x4e   :  { %507 = vmatprep.subr.bf16.mxu0 %v618_v0 }
  0x51   :  { %508 = vmatpush3.bf16.msra.mxu0 %v545_v23 }
  0x52   :  { %509 = vmatprep.subr.bf16.mxu0 %v618_v0 }
  0x55   :  { %510 = vmatpush3.bf16.msra.mxu0 %v546_v32 }
  0x56   :  { %511 = vmatprep.subr.bf16.mxu0 %v618_v0 }
  0x59   :  { %512 = vmatpush3.bf16.msra.mxu0 %v547_v33 }
  0xfc   :  { %v148_v25 = vpop.f32.mrf.mxu0 }
  0xfd   :  { %v149_v26 = vadd.f32 %v401_v24, %v148_v25 }
  0xfe   :  { %v475_v27 = vpop.f32.mrf.mxu0 }
  0xff   :  { %v154_v28 = vmax.f32 %v149_v26, 0.0 }
 0x100   :  { %v151_v29 = vpop.f32.mrf.mxu0 }
 0x101   :  { %v155_v30 = vpack.c.bf16 %v154_v28, %v154_v28 }
 0x102   :  { %v476_v31 = vpop.f32.mrf.mxu0 }
 0x103   :  { %494 = vmatmul.mubr.bf16.vlgmr.msra.gmra.mxu1 %v155_v30 }
 0x1c3   :  { %v263_v35 = vpop.f32.mrf.mxu1 }
 0x1c4   :  { %v264_v36 = vadd.f32 %v411_v34, %v263_v35 }
 0x1c5   :  { %v495_v37 = vpop.f32.mrf.mxu1 }
 0x1c6   :  { %v269_v38 = vmax.f32 %v264_v36, 0.0 }
 0x1c7   :  { %v266_v39 = vpop.f32.mrf.mxu1 }
 0x1c8   :  { %v270_v40 = vpack.c.bf16 %v269_v38, %v269_v38 }
 0x1c9   :  { %v496_v41 = vpop.f32.mrf.mxu1 }
 0x1ca   :  { %514 = vmatmul.mubr.bf16.vlgmr.msra.gmra.mxu0 %v270_v40 }
 0x28a   :  { %v378_v43 = vpop.f32.mrf.mxu0 }
 0x28b   :  { %v379_v44 = vadd.f32 %v421_v42, %v378_v43 }
 0x28c   :  { %v515_v45 = vpop.f32.mrf.mxu0 }
 0x28d   :  { %384 = vst [vmem:[#allocation7] sm:$0xff] %v379_v44 }
 0x28e   :  { %v381_v46 = vpop.f32.mrf.mxu0 }
 0x28f   :  { %599 = shalt.err (!%p596_p0)
}
 0x290   :  { %394 = dma.vmem_to_hbm [thread:$0]  %s392_s29, 128, %s692_s3, [#allocation4]   ;;  %v516_v47 = vpop.f32.mrf.mxu0 }
 0x291   :  { %612 = dma.done.wait [#allocation4], 128  }
 0x292   :  { %613 = vsyncadd [#allocation4], 4294967168 }
 0x293   :  { %398 = vsyncpa [#allocation3], 1 }
 0x294   :  { %399 = vsyncpa [#allocation6], 1 }
 0x295   :  { %400 = vsyncpa [#allocation4], 1 }

</bundles_post_ra>
